<compile_context>
chip_gen: v5e
topology: v5e:2x2
jax: 0.10.0
libtpu: 0.0.40
codegen_flags: <defaults>
</compile_context>

<pallas_src>
import functools

import jax
import jax.numpy as jnp
from jax import lax
from jax.experimental import pallas as pl
from jax.experimental.pallas import tpu as pltpu

_MIB = 1024 * 1024


def _round_up(x, m):
    return ((x + m - 1) // m) * m


# --------------------------------------------------------------------------- #
# Kernels
# --------------------------------------------------------------------------- #
def _fwd_kernel_resident(inv_ref, data_ref, w_ref, out_ref, *, groups):
    """Full-E resident-weights path.

    inv_ref  : (1, TN)      f32            -- 1 / max(||d_n||, eps) per sample
    data_ref : (TN, E)      compute dtype  -- raw (un-normalized) data tile
    w_ref    : (P_pad, E)   compute dtype  -- class-major, 8-aligned proxy rows
    out_ref  : (C, TN)      f32            -- per-class max-aggregated scores
    """
    # 'NT' contraction of the embedding axis on the MXU, f32 accumulation.
    x = lax.dot_general(
        w_ref[...], data_ref[...],
        dimension_numbers=(((1,), (1,)), ((), ())),
        preferred_element_type=jnp.float32,
    )                                                    # (P_pad, TN)
    num_cls = out_ref.shape[0]
    # Uniform, 8-aligned groups: one tile-aligned reshape, one fused sublane
    # max per class, one lane-dense unmasked store.
    cls_max = jnp.max(x.reshape(num_cls, groups, x.shape[-1]), axis=1)   # (C, TN)
    out_ref[...] = (cls_max * inv_ref[...]).astype(out_ref.dtype)


def _fwd_kernel_ktiled(inv_ref, data_ref, w_ref, out_ref, acc_ref, *, groups):
    """Embedding(K)-tiled path with an f32 VMEM accumulator (large E / v7x)."""
    k = pl.program_id(1)

    @pl.when(k == 0)
    def _init():
        acc_ref[...] = jnp.zeros_like(acc_ref)

    acc_ref[...] += lax.dot_general(
        w_ref[...], data_ref[...],
        dimension_numbers=(((1,), (1,)), ((), ())),
        preferred_element_type=jnp.float32,
    )

    @pl.when(k == pl.num_programs(1) - 1)
    def _finalize():
        num_cls = out_ref.shape[0]
        x = acc_ref[...]
        cls_max = jnp.max(x.reshape(num_cls, groups, x.shape[-1]), axis=1)
        out_ref[...] = (cls_max * inv_ref[...]).astype(out_ref.dtype)


# --------------------------------------------------------------------------- #
# VMEM budgeting / tile selection
# --------------------------------------------------------------------------- #
def _vmem_budget_bytes():
    """Generation-aware usable-VMEM budget (leaves compiler scratch headroom)."""
    cap = None
    try:
        info = pltpu.get_tpu_info()
        cap = int(getattr(info, "vmem_capacity_bytes", 0)) or None
    except Exception:
        cap = None
    if cap is None:
        cap = 64 * _MIB                    # conservative: v7x per-TC physical VMEM
    if cap <= 64 * _MIB:
        return cap - 12 * _MIB             # v7x: never request the full 64 MiB
    return cap - 24 * _MIB                 # v5e / v6e: 128 MiB physical, go past 64 MiB


def _vmem_need_bytes(tn, tk, *, p_pad, num_classes, itemsize):
    """Estimate VMEM use INCLUDING in-kernel f32 temporaries."""
    f32 = 4
    c8 = _round_up(num_classes, 8)
    need = 2 * tn * tk * itemsize          # streamed data tile (double-buffered)
    need += 2 * p_pad * tk * itemsize      # weight block (pipeline reserves 2 buffers)
    need += 2 * 8 * tn * f32               # (1, TN) inv-norm row (8-sublane padded) x2
    need += 2 * c8 * tn * f32              # (C, TN) output tile x2
    need += p_pad * tn * f32               # (P_pad, TN) f32 matmul result / accumulator
    need += c8 * tn * f32                  # (C, TN) class-max temporary
    return need


def _select_tiles(n, e, *, p_pad, num_classes, itemsize, budget, tile_n, tile_k):
    """Pick (TN, TK, num_K_tiles).  num_K_tiles == 1 means resident full-E weights."""

    def fits(tn, tk):
        need = _vmem_need_bytes(tn, tk, p_pad=p_pad, num_classes=num_classes,
                                itemsize=itemsize)
        return int(1.25 * need) + 2 * _MIB <= budget

    n_cap = max(128, _round_up(n, 128))
    if tile_n is not None:
        tn_cands = [min(n_cap, max(128, (int(tile_n) // 128) * 128))]
    else:
        # Bigger sample tiles -> closer to the HBM roofline and fewer grid steps.
        tn_cands = [t for t in (1024, 768, 512, 384, 256, 128) if t <= n_cap] or [128]

    forced_tk = None
    if tile_k is not None:
        tk = max(128, (int(tile_k) // 128) * 128)
        if tk < e:
            forced_tk = tk

    if forced_tk is not None:
        for tn in tn_cands:
            if fits(tn, forced_tk):
                return tn, forced_tk, -(-e // forced_tk)
        return tn_cands[-1], forced_tk, -(-e // forced_tk)

    # Preferred: weights fully resident along E (no K axis, no accumulator trip).
    for tn in tn_cands:
        if fits(tn, e):
            return tn, e, 1

    # Fallback: tile the embedding axis (large E, esp. under v7x's 64 MiB VMEM).
    e_cap = _round_up(e, 128)
    tk_cands = [t for t in (2048, 1024, 512, 256, 128) if t <= e_cap] or [128]
    for tn in tn_cands:
        for tk in tk_cands:
            if fits(tn, tk):
                return tn, tk, -(-e // tk)
    return 128, 128, -(-e // 128)


# --------------------------------------------------------------------------- #
# Wrapper
# --------------------------------------------------------------------------- #
def imprinted_forward(data, w1, segments, *, tile_n=None, tile_k=None,
                      compute_dtype=jnp.bfloat16, eps=1e-12):
    """Pallas ImprintedModel forward (l2/l2/max configuration).

    data          : (N, E) float array -- input feature embeddings
    w1            : (P, E) float array -- vstack of per-class imprinted weights
    segments      : tuple of (start, end) proxy-row index ranges per class
                    (static, contiguous, non-overlapping, covering all P rows)
    tile_n        : optional sample-tile width override (multiple of 128);
                    default: auto-select the largest tile fitting VMEM
    tile_k        : optional embedding-tile width; default: keep weights
                    resident along E when they fit, else auto-tile E
    compute_dtype : matmul streaming dtype (bfloat16 default; float32 for exact;
                    an fp8 dtype is possible on v7x). Accumulation/output f32.
    returns       : (C, N) float32 class scores
    """
    n, e = data.shape
    p, e_w = w1.shape
    assert e == e_w, "data / weight embedding sizes must match"

    segments = tuple((int(s), int(end)) for s, end in segments)
    num_classes = len(segments)
    assert num_classes >= 1
    # Fused segmented max assumes contiguous, non-overlapping, covering segments.
    assert segments[0][0] == 0 and segments[-1][1] == p
    assert all(segments[i][1] == segments[i + 1][0] for i in range(num_classes - 1))
    assert all(end > s for s, end in segments)

    compute_dtype = jnp.dtype(compute_dtype)
    itemsize = compute_dtype.itemsize

    # --- weights: pad every class to a uniform, 8-aligned group of g proxy rows
    # by DUPLICATING that class's rows (max over duplicates is unchanged).  This
    # keeps every segment boundary sublane-aligned and makes the in-kernel
    # per-class reduction a single reshape + max + full-block store.
    g = _round_up(max(end - s for s, end in segments), 8)
    row_ids = []
    for s, end in segments:
        idx = list(range(s, end))
        idx += [end - 1] * (g - len(idx))
        row_ids.extend(idx)
    p_pad = num_classes * g
    w_pad = jnp.take(w1, jnp.asarray(row_ids, dtype=jnp.int32), axis=0)
    w_pad = w_pad.astype(compute_dtype)

    # --- per-sample L2 scale computed ONCE in the wrapper in f32 (XLA fuses it
    # with the cast/pad pass over `data`): no second in-kernel MXU pass and no
    # f32 copy of the data tile.  1/max(||d||, eps) > 0, so it commutes with the
    # per-class max and is applied to only C*TN values after the max.
    d32 = data.astype(jnp.float32)
    inv_norm = lax.rsqrt(jnp.maximum(jnp.sum(d32 * d32, axis=1), eps * eps))   # (N,)

    # --- tile selection against the generation-aware VMEM budget.
    budget = _vmem_budget_bytes()
    tn, tk, k_tiles = _select_tiles(n, e, p_pad=p_pad, num_classes=num_classes,
                                    itemsize=itemsize, budget=budget,
                                    tile_n=tile_n, tile_k=tile_k)
    n_pad = _round_up(max(n, tn), tn)
    e_pad = tk * k_tiles
    num_n_tiles = n_pad // tn

    data_c = data.astype(compute_dtype)
    if n_pad != n or e_pad != e:
        # Zero padding is exact: padded embedding columns contribute 0 to every
        # dot product, and padded sample columns produce 0 (0 * inv_norm_pad=0)
        # and are sliced off below — they never reach the caller.
        data_c = jnp.pad(data_c, ((0, n_pad - n), (0, e_pad - e)))
    if e_pad != e:
        w_pad = jnp.pad(w_pad, ((0, 0), (0, e_pad - e)))
    inv_norm = jnp.pad(inv_norm, (0, n_pad - n)).reshape(1, n_pad)

    need = _vmem_need_bytes(tn, tk, p_pad=p_pad, num_classes=num_classes,
                            itemsize=itemsize)
    vmem_limit = int(min(budget, max(32 * _MIB, int(1.25 * need) + 2 * _MIB)))

    cost = pl.CostEstimate(
        flops=2 * p_pad * n_pad * e_pad + p_pad * n_pad + 2 * num_classes * n_pad,
        transcendentals=0,
        bytes_accessed=(n_pad * e_pad * itemsize
                        + p_pad * e_pad * itemsize * (1 if k_tiles == 1 else num_n_tiles)
                        + num_classes * n_pad * 4 + n_pad * 4),
    )

    if k_tiles == 1:
        kernel = functools.partial(_fwd_kernel_resident, groups=g)
        out_padded = pl.pallas_call(
            kernel,
            out_shape=jax.ShapeDtypeStruct((num_classes, n_pad), jnp.float32),
            grid=(num_n_tiles,),
            in_specs=[
                pl.BlockSpec((1, tn), lambda i: (0, i)),        # 1/||d_n|| row
                pl.BlockSpec((tn, e_pad), lambda i: (i, 0)),    # streamed data tiles
                # Constant index_map: weights DMA'd once and stay resident; the
                # default pipeline still reserves 2 buffers — this is included
                # in the VMEM budget above.
                pl.BlockSpec((p_pad, e_pad), lambda i: (0, 0)),
            ],
            out_specs=pl.BlockSpec((num_classes, tn), lambda i: (0, i)),
            compiler_params=pltpu.CompilerParams(
                dimension_semantics=("parallel",),   # shards N tiles across TCs (v7x)
                vmem_limit_bytes=vmem_limit,
            ),
            cost_estimate=cost,
        )(inv_norm, data_c, w_pad)
    else:
        kernel = functools.partial(_fwd_kernel_ktiled, groups=g)
        out_padded = pl.pallas_call(
            kernel,
            out_shape=jax.ShapeDtypeStruct((num_classes, n_pad), jnp.float32),
            grid=(num_n_tiles, k_tiles),
            in_specs=[
                pl.BlockSpec((1, tn), lambda i, k: (0, i)),
                pl.BlockSpec((tn, tk), lambda i, k: (i, k)),
                pl.BlockSpec((p_pad, tk), lambda i, k: (0, k)),
            ],
            out_specs=pl.BlockSpec((num_classes, tn), lambda i, k: (0, i)),
            scratch_shapes=[pltpu.VMEM((p_pad, tn), jnp.float32)],
            compiler_params=pltpu.CompilerParams(
                dimension_semantics=("parallel", "arbitrary"),
                vmem_limit_bytes=vmem_limit,
            ),
            cost_estimate=cost,
        )(inv_norm, data_c, w_pad)

    return out_padded[:, :n]


# --------------------------------------------------------------------------- #
# Pure-JAX reference + imprinting glue
# --------------------------------------------------------------------------- #
def l2_normalize_rows(x, eps=1e-12):
    nrm = jnp.sqrt(jnp.sum(x * x, axis=1, keepdims=True))
    return x / jnp.maximum(nrm, eps)


def reference_forward(data, w1, segments):
    """Pure-JAX reference mirroring the PyTorch forward (max aggregation)."""
    d = l2_normalize_rows(data)
    x = w1 @ d.T                                   # (P, N)
    rows = [jnp.max(x[s:e, :], axis=0) for (s, e) in segments]
    return jnp.stack(rows, axis=0)


# TODO(synk): 'mnn' aggregation uses sklearn NearestNeighbors + per-sample bincount
# voting on CPU; it has no clean Pallas equivalent and is not implemented here.
# TODO(synk): 'quantile' weight normalization (imprinting-time only) is not implemented.


if __name__ == "__main__":
    key = jax.random.PRNGKey(0)
    k_data, k_w, k_data2, k_w2 = jax.random.split(key, 4)

    # ---- Test 1: module-consistent tiny shapes, default bf16 streaming path.
    embedding_size = 32      # E
    num_classes = 4          # C
    proxies_per_class = 4    # rows imprinted per class via extend_ws
    num_samples = 8          # N

    raw_w = jax.random.normal(
        k_w, (num_classes * proxies_per_class, embedding_size), dtype=jnp.float32)
    w1 = l2_normalize_rows(raw_w)                  # extend_ws with normalize_weights='l2'
    segments = tuple((c * proxies_per_class, (c + 1) * proxies_per_class)
                     for c in range(num_classes))
    data = jax.random.normal(k_data, (num_samples, embedding_size), dtype=jnp.float32)

    y_ref = jax.block_until_ready(reference_forward(data, w1, segments))

    y_bf16 = jax.block_until_ready(imprinted_forward(data, w1, segments))   # bf16 default
    assert y_bf16.shape == (num_classes, num_samples)
    assert jnp.allclose(y_bf16, y_ref, atol=3e-2, rtol=3e-2), "bf16 mismatch vs reference"

    y_f32 = jax.block_until_ready(
        imprinted_forward(data, w1, segments, compute_dtype=jnp.float32))
    assert jnp.allclose(y_f32, y_ref, atol=1e-4, rtol=1e-4), "fp32 mismatch vs reference"

    # ---- Test 2: non-8-aligned proxy counts, N not a multiple of the tile width.
    e2, c2, ppc2, n2 = 256, 5, 3, 300
    w2 = l2_normalize_rows(jax.random.normal(k_w2, (c2 * ppc2, e2), dtype=jnp.float32))
    segs2 = tuple((c * ppc2, (c + 1) * ppc2) for c in range(c2))
    data2 = jax.random.normal(k_data2, (n2, e2), dtype=jnp.float32)
    y2_ref = jax.block_until_ready(reference_forward(data2, w2, segs2))
    y2 = jax.block_until_ready(
        imprinted_forward(data2, w2, segs2, compute_dtype=jnp.float32))
    assert jnp.allclose(y2, y2_ref, atol=1e-3, rtol=1e-3), "fp32 (test 2) mismatch"

    # ---- Test 3: force the embedding(K)-tiled accumulator path.
    y3 = jax.block_until_ready(
        imprinted_forward(data2, w2, segs2, compute_dtype=jnp.float32, tile_k=128))
    assert jnp.allclose(y3, y2_ref, atol=1e-3, rtol=1e-3), "K-tiled mismatch vs reference"

    print("KERNEL_OK")
</pallas_src>

<mosaic_0001>
module attributes {stable_mosaic.version = 11 : i64} {
  func.func @_fwd_kernel_resident(%arg0: i32, %arg1: memref<1x128xf32, #tpu.memory_space<vmem>>, %arg2: memref<128x32xbf16, #tpu.memory_space<vmem>>, %arg3: memref<32x32xbf16, #tpu.memory_space<vmem>>, %arg4: memref<4x128xf32, #tpu.memory_space<vmem>>) attributes {dimension_semantics = [#tpu.dimension_semantics<parallel>], iteration_bounds = array<i64: 1>, scalar_prefetch = 0 : i64, scratch_operands = 0 : i64, tpu.core_type = #tpu.core_type<tc>, window_params = [{transform_indices = @transform_0, window_bounds = array<i64: 1, 128>}, {transform_indices = @transform_1, window_bounds = array<i64: 128, 32>}, {pipeline_mode = #tpu.pipeline_mode<synchronous>, transform_indices = @transform_2, window_bounds = array<i64: 32, 32>}, {transform_indices = @transform_3, window_bounds = array<i64: 4, 128>}]} {
    %c0 = arith.constant 0 : index
    %c0_0 = arith.constant 0 : index
    %0 = vector.load %arg3[%c0, %c0_0] : memref<32x32xbf16, #tpu.memory_space<vmem>>, vector<32x32xbf16>
    %c0_1 = arith.constant 0 : index
    %c0_2 = arith.constant 0 : index
    %1 = vector.load %arg2[%c0_1, %c0_2] : memref<128x32xbf16, #tpu.memory_space<vmem>>, vector<128x32xbf16>
    %cst = arith.constant dense<0.000000e+00> : vector<32x128xf32>
    %2 = tpu.matmul %0, %1, %cst {dimension_numbers = #tpu.dot_dimension_numbers<[1], [1], [0], [0], [0, 0, 1, 0], [], []>} : vector<32x32xbf16>, vector<128x32xbf16>, vector<32x128xf32> -> vector<32x128xf32>
    %3 = vector.shape_cast %2 : vector<32x128xf32> to vector<4x8x128xf32>
    %cst_3 = arith.constant dense<0xFF800000> : vector<4x128xf32>
    %4 = vector.multi_reduction <maximumf>, %3, %cst_3 [1] : vector<4x8x128xf32> to vector<4x128xf32>
    %c0_4 = arith.constant 0 : index
    %c0_5 = arith.constant 0 : index
    %5 = vector.load %arg1[%c0_4, %c0_5] : memref<1x128xf32, #tpu.memory_space<vmem>>, vector<1x128xf32>
    %6 = vector.broadcast %5 : vector<1x128xf32> to vector<4x128xf32>
    %7 = arith.mulf %4, %6 : vector<4x128xf32>
    %c0_6 = arith.constant 0 : index
    %c0_7 = arith.constant 0 : index
    %8 = vector.load %arg4[%c0_6, %c0_7] : memref<4x128xf32, #tpu.memory_space<vmem>>, vector<4x128xf32>
    tpu.vector_store %arg4[%c0_6, %c0_7], %7 {strides = array<i32>} : memref<4x128xf32, #tpu.memory_space<vmem>>, vector<4x128xf32>,
    return
  }
  func.func @transform_0(%arg0: i32) -> (i32, i32) {
    %c0_i32 = arith.constant 0 : i32
    %c0_i32_0 = arith.constant 0 : i32
    return %c0_i32, %arg0 : i32, i32
  }
  func.func @transform_1(%arg0: i32) -> (i32, i32) {
    %c0_i32 = arith.constant 0 : i32
    %c0_i32_0 = arith.constant 0 : i32
    return %arg0, %c0_i32 : i32, i32
  }
  func.func @transform_2(%arg0: i32) -> (i32, i32) {
    %c0_i32 = arith.constant 0 : i32
    %c0_i32_0 = arith.constant 0 : i32
    %c0_i32_1 = arith.constant 0 : i32
    return %c0_i32, %c0_i32_0 : i32, i32
  }
  func.func @transform_3(%arg0: i32) -> (i32, i32) {
    %c0_i32 = arith.constant 0 : i32
    %c0_i32_0 = arith.constant 0 : i32
    return %c0_i32, %arg0 : i32, i32
  }
}

</mosaic_0001>

<bundles_post_ra>
// kernel: tpu_custom_call.1
= control target key start
LH: loop header
LB: loop body
LE: loop exit
PB: predicated region body
PF: predicated region fallthrough
CT: control target
= control target key end

     0   :  { %vm85_vm0 = vcmask 261120   ;;  %s353_s0 = inlined_call_operand.vmem [shape: f32[1,128], index: 0, kind: input, shape index: {}]   ;;  %s354_s1 = inlined_call_operand.vmem [shape: bf16[128,32], index: 1, kind: input, shape index: {}]   ;;  %s355_s2 = inlined_call_operand.vmem [shape: bf16[32,32], index: 2, kind: input, shape index: {}]   ;;  %s356_s3 = inlined_call_operand.hbm [shape: f32[4,128], index: 3, kind: output, shape index: {}]  }
   0x1   :  { %v249_v0 = vld [vmem:[%s354_s1 + $0x38] sm:$0xff] }
   0x2   :  { %v114_v1 = vsel %vm85_vm0, %v249_v0, 0 }
   0x3   :  { %8 = vsyncpa [#allocation3], 0  ;;  %116 = vmatpush.bf16.xpose.msra.mxu0 %v114_v1  ;;  %250 = vmatpush.bf16.xpose.msra.mxu1 %v114_v1  ;;  %v248_v2 = vld [vmem:[%s354_s1 + $0x30] sm:$0xff]  ;;  %v247_v4 = vld [vmem:[%s354_s1 + $0x28] sm:$0xff]  ;;  %vm172_vm1 = vcmask 1041409   ;;  %vm175_vm2 = vcmask 1042434  }
   0x4   :  { %v111_v3 = vsel %vm85_vm0, %v248_v2, 0  ;;  %v108_v5 = vsel %vm85_vm0, %v247_v4, 0  ;;  %v246_v6 = vld [vmem:[%s354_s1 + $0x20] sm:$0xff]  ;;  %v245_v8 = vld [vmem:[%s354_s1 + $0x18] sm:$0xff]  ;;  %v244_v10 = vld [vmem:[%s354_s1 + $0x10] sm:$0xff]  ;;  %s286_s5 = smov [#allocation2]  }
   0x5   :  { %v105_v7 = vsel %vm85_vm0, %v246_v6, 0  ;;  %v102_v9 = vsel %vm85_vm0, %v245_v8, 0  ;;  %v99_v11 = vsel %vm85_vm0, %v244_v10, 0  ;;  %v243_v12 = vld [vmem:[%s354_s1 + $0x8] sm:$0xff]  ;;  %v242_v14 = vld [vmem:[%s354_s1] sm:$0xff]  ;;  %s187_s6 = sshll.u32 %s286_s5, 4  ;;  %s188_s6 = int_to_ptr.vmem [resolvable:$true] %s187_s6 }
   0x6   :  { %v96_v13 = vsel %vm85_vm0, %v243_v12, 0  ;;  %v93_v15 = vsel %vm85_vm0, %v242_v14, 0  ;;  %v240_v16 = vld [vmem:[%s355_s2] sm:$0xff]  ;;  %v241_v17 = vld [vmem:[%s355_s2 + $0x8] sm:$0xff]  ;;  %s189_s9 = sshll.u32 %s356_s3, 4  ;;  %vm178_vm3 = vcmask 1043459   ;;  %s190_s9 = int_to_ptr.hbm [resolvable:$true] %s189_s9 }
   0x7   :  { %v259_v40 = vld [vmem:[%s353_s0] ss:$0 sm:$0xff] }
   0xb   :  { %117 = vmatpush.bf16.xpose.msra.mxu0 %v111_v3  ;;  %251 = vmatpush.bf16.xpose.msra.mxu1 %v111_v3 }
  0x13   :  { %118 = vmatpush.bf16.xpose.msra.mxu0 %v108_v5  ;;  %252 = vmatpush.bf16.xpose.msra.mxu1 %v108_v5 }
  0x1b   :  { %119 = vmatpush.bf16.xpose.msra.mxu0 %v105_v7  ;;  %253 = vmatpush.bf16.xpose.msra.mxu1 %v105_v7 }
  0x23   :  { %120 = vmatpush.bf16.xpose.msra.mxu0 %v102_v9  ;;  %254 = vmatpush.bf16.xpose.msra.mxu1 %v102_v9 }
  0x2b   :  { %121 = vmatpush.bf16.xpose.msra.mxu0 %v99_v11  ;;  %255 = vmatpush.bf16.xpose.msra.mxu1 %v99_v11 }
  0x33   :  { %122 = vmatpush.bf16.xpose.msra.mxu0 %v96_v13  ;;  %256 = vmatpush.bf16.xpose.msra.mxu1 %v96_v13 }
  0x3b   :  { %123 = vmatpush.bf16.xpose.msra.mxu0 %v93_v15  ;;  %257 = vmatpush.bf16.xpose.msra.mxu1 %v93_v15 }
  0x42   :  { %238 = vmatmul.msk.bf16.vlgmr.msra.gmra.mxu0 %vm85_vm0, %v240_v16  ;;  %239 = vmatmul.msk.bf16.vlgmr.msra.gmra.mxu1 %vm85_vm0, %v241_v17 }
  0xbf   :  { %v125_v18 = vpop.f32.mrf.mxu0  ;;  %v130_v19 = vpop.f32.mrf.mxu1 }
  0xc0   :  { %v135_v20 = vrot.slane %v125_v18, 4  ;;  %v147_v21 = vrot.slane %v130_v19, 4 }
  0xc2   :  { %v136_v22 = vmax.f32 %v125_v18, %v135_v20  ;;  %v148_v23 = vmax.f32 %v130_v19, %v147_v21 }
  0xc4   :  { %v149_v24 = vrot.slane %v148_v23, 2  ;;  %v137_v25 = vrot.slane %v136_v22, 2 }
  0xc6   :  { %v150_v26 = vmax.f32 %v148_v23, %v149_v24  ;;  %v138_v31 = vmax.f32 %v136_v22, %v137_v25 }
  0xc7   :  { %v127_v27 = vpop.f32.mrf.mxu0  ;;  %v132_v28 = vpop.f32.mrf.mxu1 }
  0xc8   :  { %v141_v29 = vrot.slane %v127_v27, 4  ;;  %v153_v30 = vrot.slane %v132_v28, 4  ;;  %v151_v34 = vrot.slane %v150_v26, 1  ;;  %v139_v37 = vrot.slane %v138_v31, 1 }
  0xca   :  { %v142_v32 = vmax.f32 %v127_v27, %v141_v29  ;;  %v154_v33 = vmax.f32 %v132_v28, %v153_v30  ;;  %v152_v41 = vmax.f32 %v150_v26, %v151_v34  ;;  %v140_v44 = vmax.f32 %v138_v31, %v139_v37 }
  0xcc   :  { %v143_v35 = vrot.slane %v142_v32, 2  ;;  %v155_v36 = vrot.slane %v154_v33, 2  ;;  %v165_v47 = vmul.f32 %v259_v40, %v152_v41  ;;  %v163_v50 = vmul.f32 %v259_v40, %v140_v44 }
  0xce   :  { %v144_v38 = vmax.f32 %v142_v32, %v143_v35  ;;  %v156_v39 = vmax.f32 %v154_v33, %v155_v36  ;;  %v174_v52 = vrot.slane %v165_v47, 6 }
  0xd0   :  { %v145_v42 = vrot.slane %v144_v38, 1  ;;  %v157_v43 = vrot.slane %v156_v39, 1 }
  0xd2   :  { %v146_v45 = vmax.f32 %v144_v38, %v145_v42  ;;  %v158_v46 = vmax.f32 %v156_v39, %v157_v43 }
  0xd4   :  { %v164_v48 = vmul.f32 %v259_v40, %v146_v45  ;;  %v166_v49 = vmul.f32 %v259_v40, %v158_v46 }
  0xd6   :  { %v171_v51 = vrot.slane %v164_v48, 7  ;;  %v177_v53 = vrot.slane %v166_v49, 5 }
  0xd8   :  { %v173_v54 = vsel %vm172_vm1, %v171_v51, %v163_v50 }
  0xd9   :  { %v176_v55 = vsel %vm175_vm2, %v174_v52, %v173_v54 }
  0xda   :  { %v179_v56 = vsel %vm178_vm3, %v177_v53, %v176_v55 }
  0xdb   :  { %181 = vst [vmem:[#allocation2] sm:$0xf] %v179_v56 }
  0xdc   :  { %192 = dma.vmem_to_hbm [thread:$0]  %s188_s6, 64, %s190_s9, [#allocation3]  }
  0xdd   :  { %284 = dma.done.wait [#allocation3], 64  }
  0xde   :  { %285 = vsyncadd [#allocation3], 4294967232 }
  0xdf   :  { %197 = vsyncpa [#allocation3], 1 }

</bundles_post_ra>
